<compile_context>
chip_gen: v5e
topology: v5e:2x2
jax: 0.10.0
libtpu: 0.0.40
codegen_flags: <defaults>
</compile_context>

<pallas_src>
import functools
import numpy as np
import jax
import jax.numpy as jnp
from jax.experimental import pallas as pl
from jax.experimental.pallas import tpu as pltpu

# ------------- configuration (matches DecoderConv.__init__ arguments) -------------
EMBED_DIM = 32      # embed_dim
HIDDEN_DIM = 32     # hidden_dim
N_LAYERS = 2        # n_layers
KERNEL_SIZE = 3     # kernel_size
OUTPUT_DIM = 1      # output_dim
MAX_LENGTH = 4      # max_length
TRG_PAD_IDX = 1     # trg_pad_idx (value the causal conv padding is filled with)
SCALE = float(np.sqrt(0.5))


def decoder_conv_kernel(
    # inputs
    trg_ref,           # [Bb, T, O]
    enc_conved_ref,    # [Bb, S, E]
    enc_combined_ref,  # [Bb, S, E]
    we_ref,            # packed weights with E columns       [RE, E]
    wh_ref,            # packed weights with H columns       [RH, H]
    conv_ref,          # packed conv weights+bias            [L, K*H + 1, 2H]
    # outputs
    out_ref,           # [Bb, T, O]
    attn_ref,          # [Bb, T, S]
    *, n_layers, kernel_size, pad_val):
    Bb, T, O = trg_ref.shape
    S = enc_conved_ref.shape[1]
    E = enc_conved_ref.shape[2]
    H = wh_ref.shape[1]
    K = kernel_size
    N = Bb * T

    trg = trg_ref[...].reshape(N, O)                # batch folded into rows
    enc_conved = enc_conved_ref[...]                # [Bb, S, E]
    enc_combined = enc_combined_ref[...]            # [Bb, S, E]

    # ---- unpack weights (static slices on loaded packed tensors) ----
    r = 0
    metric_w   = we_ref[r:r + O, :]; r += O         # [O, E]
    metric_b   = we_ref[r:r + 1, :]; r += 1         # [1, E]
    pos_emb    = we_ref[r:r + T, :]; r += T         # [T, E]
    attn_h2e_w = we_ref[r:r + H, :]; r += H         # [H, E]
    attn_h2e_b = we_ref[r:r + 1, :]; r += 1
    hid2emb_w  = we_ref[r:r + H, :]; r += H         # [H, E]
    hid2emb_b  = we_ref[r:r + 1, :]; r += 1
    fc_wT      = we_ref[r:r + O, :]; r += O         # [O, E]  (fc_out weight, transposed)
    fc_b_row   = we_ref[r:r + 1, :]; r += 1         # [1, E]  (only first O lanes valid)

    emb2hid_w  = wh_ref[0:E, :]                     # [E, H]
    emb2hid_b  = wh_ref[E:E + 1, :]
    attn_e2h_w = wh_ref[E + 1:2 * E + 1, :]         # [E, H]
    attn_e2h_b = wh_ref[2 * E + 1:2 * E + 2, :]

    # ---- metric embedding + positional embedding (dropout == identity) ----
    if O == 1:
        # rank-1 "matmul" => outer product on the VPU
        trg_emb = trg * metric_w                    # [N,1] * [1,E] -> [N,E]
    else:
        trg_emb = jnp.dot(trg, metric_w, preferred_element_type=jnp.float32)
    embedded = trg_emb + metric_b + jnp.tile(pos_emb, (Bb, 1))      # [N, E]

    # ---- emb2hid ----
    x = jnp.dot(embedded, emb2hid_w,
                preferred_element_type=jnp.float32) + emb2hid_b     # [N, H]

    pad_rows = jnp.full((Bb, K - 1, H), pad_val, jnp.float32)
    attention = jnp.zeros((Bb, T, S), jnp.float32)

    for l in range(n_layers):
        # causal padding built in registers, then im2col: one matmul per layer
        x3 = x.reshape(Bb, T, H)
        padded = jnp.concatenate([pad_rows, x3], axis=1)            # [Bb, T+K-1, H]
        xk_cat = jnp.concatenate([padded[:, k:k + T, :] for k in range(K)],
                                 axis=2)                            # [Bb, T, K*H]
        xk_flat = xk_cat.reshape(N, K * H)

        conv_w = conv_ref[l, 0:K * H, :]                            # [K*H, 2H]
        conv_b = conv_ref[l, K * H:K * H + 1, :]                    # [1, 2H]
        acc = jnp.dot(xk_flat, conv_w,
                      preferred_element_type=jnp.float32) + conv_b  # [N, 2H]
        glu = acc[:, :H] * jax.nn.sigmoid(acc[:, H:])               # GLU, [N, H]

        # ---- attention block (per-batch, batched dot_general) ----
        conved_emb = jnp.dot(glu, attn_h2e_w,
                             preferred_element_type=jnp.float32) + attn_h2e_b
        combined = (conved_emb + embedded) * SCALE                  # [N, E]
        combined3 = combined.reshape(Bb, T, E)
        energy = jax.lax.dot_general(combined3, enc_conved,
                                     (((2,), (2,)), ((0,), (0,))),
                                     preferred_element_type=jnp.float32)   # [Bb,T,S]
        energy = energy - jnp.max(energy, axis=-1, keepdims=True)
        p = jnp.exp(energy)
        inv_den = pl.reciprocal(jnp.sum(p, axis=-1, keepdims=True), approx=True)
        attention = p * inv_den                                     # softmax
        attended = jax.lax.dot_general(attention, enc_combined,
                                       (((2,), (1,)), ((0,), (0,))),
                                       preferred_element_type=jnp.float32) # [Bb,T,E]
        attended_h = jnp.dot(attended.reshape(N, E), attn_e2h_w,
                             preferred_element_type=jnp.float32) + attn_e2h_b
        conved_c = (glu + attended_h) * SCALE                       # [N, H]

        # residual
        x = (conved_c + x) * SCALE

    # ---- hid2emb + fc_out (dropout == identity) ----
    conved_e = jnp.dot(x, hid2emb_w,
                       preferred_element_type=jnp.float32) + hid2emb_b     # [N, E]
    if O == 1:
        # rank-1 projection: multiply + lane reduction on the VPU/XLU
        out = jnp.sum(conved_e * fc_wT, axis=-1, keepdims=True) + fc_b_row[0:1, 0:1]
    else:
        out = jax.lax.dot_general(conved_e, fc_wT, (((1,), (1,)), ((), ())),
                                  preferred_element_type=jnp.float32) + fc_b_row[:, :O]

    out_ref[...] = out.reshape(Bb, T, O).astype(out_ref.dtype)
    attn_ref[...] = attention.astype(attn_ref.dtype)


def decoder_conv_forward(trg, enc_conved, enc_combined, params):
    B, T, O = trg.shape
    S = enc_conved.shape[1]
    E, H, L, K = EMBED_DIM, HIDDEN_DIM, N_LAYERS, KERNEL_SIZE

    # ---- pack the many small weights into 3 VMEM inputs ----
    fc_b_row = jnp.zeros((1, E), jnp.float32).at[:, :O].set(params["fc_b"])
    we_pack = jnp.concatenate([
        params["metric_w"],               # [O, E]
        params["metric_b"],               # [1, E]
        params["pos_table"][:T],          # [T, E]   (positions are arange(T))
        params["attn_h2e_w"],             # [H, E]
        params["attn_h2e_b"],             # [1, E]
        params["hid2emb_w"],              # [H, E]
        params["hid2emb_b"],              # [1, E]
        params["fc_w"].T,                 # [O, E]
        fc_b_row,                         # [1, E]
    ], axis=0).astype(jnp.float32)
    wh_pack = jnp.concatenate([
        params["emb2hid_w"], params["emb2hid_b"],
        params["attn_e2h_w"], params["attn_e2h_b"],
    ], axis=0).astype(jnp.float32)
    # fused value/gate conv weights: rows ordered (tap k, in-channel), cols [value|gate]
    conv_w = jnp.concatenate([params["conv_wa"], params["conv_wg"]], axis=-1)  # [L,K,H,2H]
    conv_w = conv_w.reshape(L, K * H, 2 * H)
    conv_b = jnp.concatenate([params["conv_ba"], params["conv_bg"]], axis=-1)  # [L,1,2H]
    conv_pack = jnp.concatenate([conv_w, conv_b], axis=1).astype(jnp.float32)  # [L,K*H+1,2H]

    BBLK = B                      # whole (tiny) batch per grid step
    grid = (B // BBLK,)

    kernel = functools.partial(decoder_conv_kernel, n_layers=L,
                               kernel_size=K, pad_val=float(TRG_PAD_IDX))

    in_specs = [
        pl.BlockSpec((BBLK, T, O), lambda b: (b, 0, 0)),   # trg
        pl.BlockSpec((BBLK, S, E), lambda b: (b, 0, 0)),   # encoder_conved
        pl.BlockSpec((BBLK, S, E), lambda b: (b, 0, 0)),   # encoder_combined
        pl.BlockSpec(we_pack.shape, lambda b: (0, 0)),     # packed E-column weights
        pl.BlockSpec(wh_pack.shape, lambda b: (0, 0)),     # packed H-column weights
        pl.BlockSpec(conv_pack.shape, lambda b: (0, 0, 0)),  # packed conv weights
    ]
    out_specs = [
        pl.BlockSpec((BBLK, T, O), lambda b: (b, 0, 0)),
        pl.BlockSpec((BBLK, T, S), lambda b: (b, 0, 0)),
    ]
    out_shape = [
        jax.ShapeDtypeStruct((B, T, O), jnp.float32),
        jax.ShapeDtypeStruct((B, T, S), jnp.float32),
    ]
    return pl.pallas_call(
        kernel,
        grid=grid,
        in_specs=in_specs,
        out_specs=out_specs,
        out_shape=out_shape,
        compiler_params=pltpu.CompilerParams(dimension_semantics=("parallel",)),
    )(trg, enc_conved, enc_combined, we_pack, wh_pack, conv_pack)


def decoder_conv_reference(trg, enc_conved, enc_combined, params):
    """Pure-JAX reference mirroring the PyTorch forward (eval mode)."""
    B, T, _ = trg.shape
    H, K, L = HIDDEN_DIM, KERNEL_SIZE, N_LAYERS
    trg_emb = trg @ params["metric_w"] + params["metric_b"]
    embedded = trg_emb + params["pos_table"][None, :T]
    x = embedded @ params["emb2hid_w"] + params["emb2hid_b"]              # [B, T, H]
    attention = None
    for l in range(L):
        padded = jnp.concatenate(
            [jnp.full((B, K - 1, H), float(TRG_PAD_IDX), jnp.float32), x], axis=1)
        acc_a = jnp.zeros((B, T, H)) + params["conv_ba"][l]
        acc_g = jnp.zeros((B, T, H)) + params["conv_bg"][l]
        for k in range(K):
            acc_a = acc_a + padded[:, k:k + T, :] @ params["conv_wa"][l, k]
            acc_g = acc_g + padded[:, k:k + T, :] @ params["conv_wg"][l, k]
        glu = acc_a * jax.nn.sigmoid(acc_g)
        conved_emb = glu @ params["attn_h2e_w"] + params["attn_h2e_b"]
        combined = (conved_emb + embedded) * SCALE
        energy = jnp.einsum("bte,bse->bts", combined, enc_conved)
        attention = jax.nn.softmax(energy, axis=-1)
        attended = jnp.einsum("bts,bse->bte", attention, enc_combined)
        attended_h = attended @ params["attn_e2h_w"] + params["attn_e2h_b"]
        conved_c = (glu + attended_h) * SCALE
        x = (conved_c + x) * SCALE
    conved_e = x @ params["hid2emb_w"] + params["hid2emb_b"]
    out = conved_e @ params["fc_w"] + params["fc_b"]
    return out, attention


def init_params(key):
    E, H, L, K, O, ML = EMBED_DIM, HIDDEN_DIM, N_LAYERS, KERNEL_SIZE, OUTPUT_DIM, MAX_LENGTH
    keys = jax.random.split(key, 20)
    n = lambda i, shape, s=0.1: (s * jax.random.normal(keys[i], shape)).astype(jnp.float32)
    return {
        "metric_w":   n(0, (O, E)),        # Linear(output_dim, embed_dim), pre-transposed
        "metric_b":   n(1, (1, E)),
        "pos_table":  n(2, (ML, E)),       # Embedding(max_length, embed_dim)
        "emb2hid_w":  n(3, (E, H)),
        "emb2hid_b":  n(4, (1, H)),
        "attn_h2e_w": n(5, (H, E)),
        "attn_h2e_b": n(6, (1, E)),
        "attn_e2h_w": n(7, (E, H)),
        "attn_e2h_b": n(8, (1, H)),
        # Conv1d(H, 2H, K): weight split into value/gate halves, stored as [L, K, H_in, H_out]
        "conv_wa":    n(9,  (L, K, H, H)),
        "conv_wg":    n(10, (L, K, H, H)),
        "conv_ba":    n(11, (L, 1, H)),
        "conv_bg":    n(12, (L, 1, H)),
        "hid2emb_w":  n(13, (H, E)),
        "hid2emb_b":  n(14, (1, E)),
        "fc_w":       n(15, (E, O)),
        "fc_b":       n(16, (1, O)),
    }


if __name__ == "__main__":
    key = jax.random.PRNGKey(0)
    kp, k1, k2, k3 = jax.random.split(key, 4)
    params = init_params(kp)

    B, T, S = 2, MAX_LENGTH, 8
    trg = jax.random.normal(k1, (B, T, OUTPUT_DIM), jnp.float32)
    encoder_conved = jax.random.normal(k2, (B, S, EMBED_DIM), jnp.float32)
    encoder_combined = jax.random.normal(k3, (B, S, EMBED_DIM), jnp.float32)

    out, attn = decoder_conv_forward(trg, encoder_conved, encoder_combined, params)
    jax.block_until_ready((out, attn))

    out_ref, attn_ref = decoder_conv_reference(trg, encoder_conved, encoder_combined, params)
    assert out.shape == (B, T, OUTPUT_DIM) and attn.shape == (B, T, S)
    assert np.allclose(np.asarray(out), np.asarray(out_ref), atol=5e-2, rtol=5e-2)
    assert np.allclose(np.asarray(attn), np.asarray(attn_ref), atol=5e-2, rtol=5e-2)
    print("KERNEL_OK")
</pallas_src>

<mosaic_0001>
module attributes {stable_mosaic.version = 11 : i64} {
  func.func @decoder_conv_kernel(%arg0: i32, %arg1: memref<2x4x1xf32, #tpu.memory_space<vmem>>, %arg2: memref<2x8x32xf32, #tpu.memory_space<vmem>>, %arg3: memref<2x8x32xf32, #tpu.memory_space<vmem>>, %arg4: memref<74x32xf32, #tpu.memory_space<vmem>>, %arg5: memref<66x32xf32, #tpu.memory_space<vmem>>, %arg6: memref<2x97x64xf32, #tpu.memory_space<vmem>>, %arg7: memref<2x4x1xf32, #tpu.memory_space<vmem>>, %arg8: memref<2x4x8xf32, #tpu.memory_space<vmem>>) attributes {dimension_semantics = [#tpu.dimension_semantics<parallel>], iteration_bounds = array<i64: 1>, scalar_prefetch = 0 : i64, scratch_operands = 0 : i64, tpu.core_type = #tpu.core_type<tc>, window_params = [{transform_indices = @transform_0, window_bounds = array<i64: 2, 4, 1>}, {transform_indices = @transform_1, window_bounds = array<i64: 2, 8, 32>}, {transform_indices = @transform_2, window_bounds = array<i64: 2, 8, 32>}, {pipeline_mode = #tpu.pipeline_mode<synchronous>, transform_indices = @transform_3, window_bounds = array<i64: 74, 32>}, {pipeline_mode = #tpu.pipeline_mode<synchronous>, transform_indices = @transform_4, window_bounds = array<i64: 66, 32>}, {pipeline_mode = #tpu.pipeline_mode<synchronous>, transform_indices = @transform_5, window_bounds = array<i64: 2, 97, 64>}, {transform_indices = @transform_6, window_bounds = array<i64: 2, 4, 1>}, {transform_indices = @transform_7, window_bounds = array<i64: 2, 4, 8>}]} {
    %c0 = arith.constant 0 : index
    %c0_0 = arith.constant 0 : index
    %c0_1 = arith.constant 0 : index
    %0 = vector.load %arg1[%c0, %c0_0, %c0_1] : memref<2x4x1xf32, #tpu.memory_space<vmem>>, vector<2x4x1xf32>
    %1 = vector.shape_cast %0 : vector<2x4x1xf32> to vector<8x1xf32>
    %c0_2 = arith.constant 0 : index
    %c0_3 = arith.constant 0 : index
    %c0_4 = arith.constant 0 : index
    %2 = vector.load %arg2[%c0_2, %c0_3, %c0_4] : memref<2x8x32xf32, #tpu.memory_space<vmem>>, vector<2x8x32xf32>
    %c0_5 = arith.constant 0 : index
    %c0_6 = arith.constant 0 : index
    %c0_7 = arith.constant 0 : index
    %3 = vector.load %arg3[%c0_5, %c0_6, %c0_7] : memref<2x8x32xf32, #tpu.memory_space<vmem>>, vector<2x8x32xf32>
    %c0_8 = arith.constant 0 : index
    %c0_9 = arith.constant 0 : index
    %4 = vector.load %arg4[%c0_8, %c0_9] : memref<74x32xf32, #tpu.memory_space<vmem>>, vector<1x32xf32>
    %c1 = arith.constant 1 : index
    %c0_10 = arith.constant 0 : index
    %5 = vector.load %arg4[%c1, %c0_10] : memref<74x32xf32, #tpu.memory_space<vmem>>, vector<1x32xf32>
    %c2 = arith.constant 2 : index
    %c0_11 = arith.constant 0 : index
    %6 = vector.load %arg4[%c2, %c0_11] : memref<74x32xf32, #tpu.memory_space<vmem>>, vector<4x32xf32>
    %c6 = arith.constant 6 : index
    %c0_12 = arith.constant 0 : index
    %7 = vector.load %arg4[%c6, %c0_12] : memref<74x32xf32, #tpu.memory_space<vmem>>, vector<32x32xf32>
    %c38 = arith.constant 38 : index
    %c0_13 = arith.constant 0 : index
    %8 = vector.load %arg4[%c38, %c0_13] : memref<74x32xf32, #tpu.memory_space<vmem>>, vector<1x32xf32>
    %c39 = arith.constant 39 : index
    %c0_14 = arith.constant 0 : index
    %9 = vector.load %arg4[%c39, %c0_14] : memref<74x32xf32, #tpu.memory_space<vmem>>, vector<32x32xf32>
    %c71 = arith.constant 71 : index
    %c0_15 = arith.constant 0 : index
    %10 = vector.load %arg4[%c71, %c0_15] : memref<74x32xf32, #tpu.memory_space<vmem>>, vector<1x32xf32>
    %c72 = arith.constant 72 : index
    %c0_16 = arith.constant 0 : index
    %11 = vector.load %arg4[%c72, %c0_16] : memref<74x32xf32, #tpu.memory_space<vmem>>, vector<1x32xf32>
    %c73 = arith.constant 73 : index
    %c0_17 = arith.constant 0 : index
    %12 = vector.load %arg4[%c73, %c0_17] : memref<74x32xf32, #tpu.memory_space<vmem>>, vector<1x32xf32>
    %c0_18 = arith.constant 0 : index
    %c0_19 = arith.constant 0 : index
    %13 = vector.load %arg5[%c0_18, %c0_19] : memref<66x32xf32, #tpu.memory_space<vmem>>, vector<32x32xf32>
    %c32 = arith.constant 32 : index
    %c0_20 = arith.constant 0 : index
    %14 = vector.load %arg5[%c32, %c0_20] : memref<66x32xf32, #tpu.memory_space<vmem>>, vector<1x32xf32>
    %c33 = arith.constant 33 : index
    %c0_21 = arith.constant 0 : index
    %15 = vector.load %arg5[%c33, %c0_21] : memref<66x32xf32, #tpu.memory_space<vmem>>, vector<32x32xf32>
    %c65 = arith.constant 65 : index
    %c0_22 = arith.constant 0 : index
    %16 = vector.load %arg5[%c65, %c0_22] : memref<66x32xf32, #tpu.memory_space<vmem>>, vector<1x32xf32>
    %17 = vector.broadcast %1 : vector<8x1xf32> to vector<8x32xf32>
    %18 = vector.broadcast %4 : vector<1x32xf32> to vector<8x32xf32>
    %19 = arith.mulf %17, %18 : vector<8x32xf32>
    %20 = vector.broadcast %5 : vector<1x32xf32> to vector<8x32xf32>
    %21 = arith.addf %19, %20 : vector<8x32xf32>
    %22 = tpu.concatenate %6, %6 in 0 : vector<4x32xf32>, vector<4x32xf32> -> vector<8x32xf32>
    %23 = arith.addf %21, %22 : vector<8x32xf32>
    %cst = arith.constant dense<0.000000e+00> : vector<8x32xf32>
    %24 = tpu.matmul %23, %13, %cst {dimension_numbers = #tpu.dot_dimension_numbers<[1], [0], [0], [1], [0, 0, 1, 1], [], []>} : vector<8x32xf32>, vector<32x32xf32>, vector<8x32xf32> -> vector<8x32xf32>
    %25 = vector.broadcast %14 : vector<1x32xf32> to vector<8x32xf32>
    %26 = arith.addf %24, %25 : vector<8x32xf32>
    %cst_23 = arith.constant 1.000000e+00 : f32
    %27 = vector.broadcast %cst_23 : f32 to vector<2x2x32xf32>
    %28 = vector.shape_cast %26 : vector<8x32xf32> to vector<2x4x32xf32>
    %29 = tpu.concatenate %27, %28 in 1 : vector<2x2x32xf32>, vector<2x4x32xf32> -> vector<2x6x32xf32>
    %30 = vector.extract_strided_slice %29 {offsets = [0, 0, 0], sizes = [2, 4, 32], strides = [1, 1, 1]} : vector<2x6x32xf32> to vector<2x4x32xf32>
    %31 = vector.extract_strided_slice %29 {offsets = [0, 1, 0], sizes = [2, 4, 32], strides = [1, 1, 1]} : vector<2x6x32xf32> to vector<2x4x32xf32>
    %32 = vector.extract_strided_slice %29 {offsets = [0, 2, 0], sizes = [2, 4, 32], strides = [1, 1, 1]} : vector<2x6x32xf32> to vector<2x4x32xf32>
    %33 = tpu.concatenate %30, %31, %32 in 2 : vector<2x4x32xf32>, vector<2x4x32xf32>, vector<2x4x32xf32> -> vector<2x4x96xf32>
    %34 = vector.shape_cast %33 : vector<2x4x96xf32> to vector<8x96xf32>
    %c0_24 = arith.constant 0 : index
    %c0_25 = arith.constant 0 : index
    %c0_26 = arith.constant 0 : index
    %35 = vector.load %arg6[%c0_24, %c0_25, %c0_26] : memref<2x97x64xf32, #tpu.memory_space<vmem>>, vector<1x96x64xf32>
    %36 = vector.shape_cast %35 : vector<1x96x64xf32> to vector<96x64xf32>
    %c0_27 = arith.constant 0 : index
    %c96 = arith.constant 96 : index
    %c0_28 = arith.constant 0 : index
    %37 = vector.load %arg6[%c0_27, %c96, %c0_28] : memref<2x97x64xf32, #tpu.memory_space<vmem>>, vector<1x1x64xf32>
    %38 = vector.shape_cast %37 : vector<1x1x64xf32> to vector<1x64xf32>
    %cst_29 = arith.constant dense<0.000000e+00> : vector<8x64xf32>
    %39 = tpu.matmul %34, %36, %cst_29 {dimension_numbers = #tpu.dot_dimension_numbers<[1], [0], [0], [1], [0, 0, 1, 1], [], []>} : vector<8x96xf32>, vector<96x64xf32>, vector<8x64xf32> -> vector<8x64xf32>
    %40 = vector.broadcast %38 : vector<1x64xf32> to vector<8x64xf32>
    %41 = arith.addf %39, %40 : vector<8x64xf32>
    %42 = vector.extract_strided_slice %41 {offsets = [0, 0], sizes = [8, 32], strides = [1, 1]} : vector<8x64xf32> to vector<8x32xf32>
    %43 = vector.extract_strided_slice %41 {offsets = [0, 32], sizes = [8, 32], strides = [1, 1]} : vector<8x64xf32> to vector<8x32xf32>
    %44 = arith.negf %43 : vector<8x32xf32>
    %45 = math.exp %44 : vector<8x32xf32>
    %cst_30 = arith.constant 1.000000e+00 : f32
    %46 = vector.broadcast %cst_30 : f32 to vector<8x32xf32>
    %47 = arith.addf %46, %45 : vector<8x32xf32>
    %48 = arith.divf %46, %47 : vector<8x32xf32>
    %49 = arith.mulf %42, %48 : vector<8x32xf32>
    %cst_31 = arith.constant dense<0.000000e+00> : vector<8x32xf32>
    %50 = tpu.matmul %49, %7, %cst_31 {dimension_numbers = #tpu.dot_dimension_numbers<[1], [0], [0], [1], [0, 0, 1, 1], [], []>} : vector<8x32xf32>, vector<32x32xf32>, vector<8x32xf32> -> vector<8x32xf32>
    %51 = vector.broadcast %8 : vector<1x32xf32> to vector<8x32xf32>
    %52 = arith.addf %50, %51 : vector<8x32xf32>
    %53 = arith.addf %52, %23 : vector<8x32xf32>
    %cst_32 = arith.constant 0.707106769 : f32
    %54 = vector.broadcast %cst_32 : f32 to vector<8x32xf32>
    %55 = arith.mulf %53, %54 : vector<8x32xf32>
    %56 = vector.shape_cast %55 : vector<8x32xf32> to vector<2x4x32xf32>
    %cst_33 = arith.constant dense<0.000000e+00> : vector<2x4x8xf32>
    %57 = tpu.matmul %56, %2, %cst_33 {dimension_numbers = #tpu.dot_dimension_numbers<[2], [2], [1], [1], [0, 0, 0, 1, 1, 1], [0], [0]>} : vector<2x4x32xf32>, vector<2x8x32xf32>, vector<2x4x8xf32> -> vector<2x4x8xf32>
    %cst_34 = arith.constant dense<0xFF800000> : vector<2x4xf32>
    %58 = vector.multi_reduction <maximumf>, %57, %cst_34 [2] : vector<2x4x8xf32> to vector<2x4xf32>
    %59 = vector.shape_cast %58 : vector<2x4xf32> to vector<2x4x1xf32>
    %60 = vector.broadcast %59 : vector<2x4x1xf32> to vector<2x4x8xf32>
    %61 = arith.subf %57, %60 : vector<2x4x8xf32>
    %62 = math.exp %61 : vector<2x4x8xf32>
    %cst_35 = arith.constant dense<0.000000e+00> : vector<2x4xf32>
    %63 = vector.multi_reduction <add>, %62, %cst_35 [2] : vector<2x4x8xf32> to vector<2x4xf32>
    %64 = vector.shape_cast %63 : vector<2x4xf32> to vector<2x4x1xf32>
    %65 = tpu.reciprocal %64 {approx = true} : vector<2x4x1xf32> -> vector<2x4x1xf32>
    %66 = vector.broadcast %65 : vector<2x4x1xf32> to vector<2x4x8xf32>
    %67 = arith.mulf %62, %66 : vector<2x4x8xf32>
    %cst_36 = arith.constant dense<0.000000e+00> : vector<2x4x32xf32>
    %68 = tpu.matmul %67, %3, %cst_36 {dimension_numbers = #tpu.dot_dimension_numbers<[2], [1], [1], [2], [0, 0, 0, 1, 1, 2], [0], [0]>} : vector<2x4x8xf32>, vector<2x8x32xf32>, vector<2x4x32xf32> -> vector<2x4x32xf32>
    %69 = vector.shape_cast %68 : vector<2x4x32xf32> to vector<8x32xf32>
    %cst_37 = arith.constant dense<0.000000e+00> : vector<8x32xf32>
    %70 = tpu.matmul %69, %15, %cst_37 {dimension_numbers = #tpu.dot_dimension_numbers<[1], [0], [0], [1], [0, 0, 1, 1], [], []>} : vector<8x32xf32>, vector<32x32xf32>, vector<8x32xf32> -> vector<8x32xf32>
    %71 = vector.broadcast %16 : vector<1x32xf32> to vector<8x32xf32>
    %72 = arith.addf %70, %71 : vector<8x32xf32>
    %73 = arith.addf %49, %72 : vector<8x32xf32>
    %cst_38 = arith.constant 0.707106769 : f32
    %74 = vector.broadcast %cst_38 : f32 to vector<8x32xf32>
    %75 = arith.mulf %73, %74 : vector<8x32xf32>
    %76 = arith.addf %75, %26 : vector<8x32xf32>
    %cst_39 = arith.constant 0.707106769 : f32
    %77 = vector.broadcast %cst_39 : f32 to vector<8x32xf32>
    %78 = arith.mulf %76, %77 : vector<8x32xf32>
    %79 = vector.shape_cast %78 : vector<8x32xf32> to vector<2x4x32xf32>
    %80 = tpu.concatenate %27, %79 in 1 : vector<2x2x32xf32>, vector<2x4x32xf32> -> vector<2x6x32xf32>
    %81 = vector.extract_strided_slice %80 {offsets = [0, 0, 0], sizes = [2, 4, 32], strides = [1, 1, 1]} : vector<2x6x32xf32> to vector<2x4x32xf32>
    %82 = vector.extract_strided_slice %80 {offsets = [0, 1, 0], sizes = [2, 4, 32], strides = [1, 1, 1]} : vector<2x6x32xf32> to vector<2x4x32xf32>
    %83 = vector.extract_strided_slice %80 {offsets = [0, 2, 0], sizes = [2, 4, 32], strides = [1, 1, 1]} : vector<2x6x32xf32> to vector<2x4x32xf32>
    %84 = tpu.concatenate %81, %82, %83 in 2 : vector<2x4x32xf32>, vector<2x4x32xf32>, vector<2x4x32xf32> -> vector<2x4x96xf32>
    %85 = vector.shape_cast %84 : vector<2x4x96xf32> to vector<8x96xf32>
    %c1_40 = arith.constant 1 : index
    %c0_41 = arith.constant 0 : index
    %c0_42 = arith.constant 0 : index
    %86 = vector.load %arg6[%c1_40, %c0_41, %c0_42] : memref<2x97x64xf32, #tpu.memory_space<vmem>>, vector<1x96x64xf32>
    %87 = vector.shape_cast %86 : vector<1x96x64xf32> to vector<96x64xf32>
    %c1_43 = arith.constant 1 : index
    %c96_44 = arith.constant 96 : index
    %c0_45 = arith.constant 0 : index
    %88 = vector.load %arg6[%c1_43, %c96_44, %c0_45] : memref<2x97x64xf32, #tpu.memory_space<vmem>>, vector<1x1x64xf32>
    %89 = vector.shape_cast %88 : vector<1x1x64xf32> to vector<1x64xf32>
    %cst_46 = arith.constant dense<0.000000e+00> : vector<8x64xf32>
    %90 = tpu.matmul %85, %87, %cst_46 {dimension_numbers = #tpu.dot_dimension_numbers<[1], [0], [0], [1], [0, 0, 1, 1], [], []>} : vector<8x96xf32>, vector<96x64xf32>, vector<8x64xf32> -> vector<8x64xf32>
    %91 = vector.broadcast %89 : vector<1x64xf32> to vector<8x64xf32>
    %92 = arith.addf %90, %91 : vector<8x64xf32>
    %93 = vector.extract_strided_slice %92 {offsets = [0, 0], sizes = [8, 32], strides = [1, 1]} : vector<8x64xf32> to vector<8x32xf32>
    %94 = vector.extract_strided_slice %92 {offsets = [0, 32], sizes = [8, 32], strides = [1, 1]} : vector<8x64xf32> to vector<8x32xf32>
    %95 = arith.negf %94 : vector<8x32xf32>
    %96 = math.exp %95 : vector<8x32xf32>
    %cst_47 = arith.constant 1.000000e+00 : f32
    %97 = vector.broadcast %cst_47 : f32 to vector<8x32xf32>
    %98 = arith.addf %97, %96 : vector<8x32xf32>
    %99 = arith.divf %97, %98 : vector<8x32xf32>
    %100 = arith.mulf %93, %99 : vector<8x32xf32>
    %cst_48 = arith.constant dense<0.000000e+00> : vector<8x32xf32>
    %101 = tpu.matmul %100, %7, %cst_48 {dimension_numbers = #tpu.dot_dimension_numbers<[1], [0], [0], [1], [0, 0, 1, 1], [], []>} : vector<8x32xf32>, vector<32x32xf32>, vector<8x32xf32> -> vector<8x32xf32>
    %102 = vector.broadcast %8 : vector<1x32xf32> to vector<8x32xf32>
    %103 = arith.addf %101, %102 : vector<8x32xf32>
    %104 = arith.addf %103, %23 : vector<8x32xf32>
    %cst_49 = arith.constant 0.707106769 : f32
    %105 = vector.broadcast %cst_49 : f32 to vector<8x32xf32>
    %106 = arith.mulf %104, %105 : vector<8x32xf32>
    %107 = vector.shape_cast %106 : vector<8x32xf32> to vector<2x4x32xf32>
    %cst_50 = arith.constant dense<0.000000e+00> : vector<2x4x8xf32>
    %108 = tpu.matmul %107, %2, %cst_50 {dimension_numbers = #tpu.dot_dimension_numbers<[2], [2], [1], [1], [0, 0, 0, 1, 1, 1], [0], [0]>} : vector<2x4x32xf32>, vector<2x8x32xf32>, vector<2x4x8xf32> -> vector<2x4x8xf32>
    %cst_51 = arith.constant dense<0xFF800000> : vector<2x4xf32>
    %109 = vector.multi_reduction <maximumf>, %108, %cst_51 [2] : vector<2x4x8xf32> to vector<2x4xf32>
    %110 = vector.shape_cast %109 : vector<2x4xf32> to vector<2x4x1xf32>
    %111 = vector.broadcast %110 : vector<2x4x1xf32> to vector<2x4x8xf32>
    %112 = arith.subf %108, %111 : vector<2x4x8xf32>
    %113 = math.exp %112 : vector<2x4x8xf32>
    %cst_52 = arith.constant dense<0.000000e+00> : vector<2x4xf32>
    %114 = vector.multi_reduction <add>, %113, %cst_52 [2] : vector<2x4x8xf32> to vector<2x4xf32>
    %115 = vector.shape_cast %114 : vector<2x4xf32> to vector<2x4x1xf32>
    %116 = tpu.reciprocal %115 {approx = true} : vector<2x4x1xf32> -> vector<2x4x1xf32>
    %117 = vector.broadcast %116 : vector<2x4x1xf32> to vector<2x4x8xf32>
    %118 = arith.mulf %113, %117 : vector<2x4x8xf32>
    %cst_53 = arith.constant dense<0.000000e+00> : vector<2x4x32xf32>
    %119 = tpu.matmul %118, %3, %cst_53 {dimension_numbers = #tpu.dot_dimension_numbers<[2], [1], [1], [2], [0, 0, 0, 1, 1, 2], [0], [0]>} : vector<2x4x8xf32>, vector<2x8x32xf32>, vector<2x4x32xf32> -> vector<2x4x32xf32>
    %120 = vector.shape_cast %119 : vector<2x4x32xf32> to vector<8x32xf32>
    %cst_54 = arith.constant dense<0.000000e+00> : vector<8x32xf32>
    %121 = tpu.matmul %120, %15, %cst_54 {dimension_numbers = #tpu.dot_dimension_numbers<[1], [0], [0], [1], [0, 0, 1, 1], [], []>} : vector<8x32xf32>, vector<32x32xf32>, vector<8x32xf32> -> vector<8x32xf32>
    %122 = vector.broadcast %16 : vector<1x32xf32> to vector<8x32xf32>
    %123 = arith.addf %121, %122 : vector<8x32xf32>
    %124 = arith.addf %100, %123 : vector<8x32xf32>
    %cst_55 = arith.constant 0.707106769 : f32
    %125 = vector.broadcast %cst_55 : f32 to vector<8x32xf32>
    %126 = arith.mulf %124, %125 : vector<8x32xf32>
    %127 = arith.addf %126, %78 : vector<8x32xf32>
    %cst_56 = arith.constant 0.707106769 : f32
    %128 = vector.broadcast %cst_56 : f32 to vector<8x32xf32>
    %129 = arith.mulf %127, %128 : vector<8x32xf32>
    %cst_57 = arith.constant dense<0.000000e+00> : vector<8x32xf32>
    %130 = tpu.matmul %129, %9, %cst_57 {dimension_numbers = #tpu.dot_dimension_numbers<[1], [0], [0], [1], [0, 0, 1, 1], [], []>} : vector<8x32xf32>, vector<32x32xf32>, vector<8x32xf32> -> vector<8x32xf32>
    %131 = vector.broadcast %10 : vector<1x32xf32> to vector<8x32xf32>
    %132 = arith.addf %130, %131 : vector<8x32xf32>
    %133 = vector.broadcast %11 : vector<1x32xf32> to vector<8x32xf32>
    %134 = arith.mulf %132, %133 : vector<8x32xf32>
    %cst_58 = arith.constant dense<0.000000e+00> : vector<8xf32>
    %135 = vector.multi_reduction <add>, %134, %cst_58 [1] : vector<8x32xf32> to vector<8xf32>
    %136 = vector.shape_cast %135 : vector<8xf32> to vector<8x1xf32>
    %137 = vector.extract_strided_slice %12 {offsets = [0, 0], sizes = [1, 1], strides = [1, 1]} : vector<1x32xf32> to vector<1x1xf32>
    %138 = vector.broadcast %137 : vector<1x1xf32> to vector<8x1xf32>
    %139 = arith.addf %136, %138 : vector<8x1xf32>
    %140 = vector.shape_cast %139 : vector<8x1xf32> to vector<2x4x1xf32>
    %c0_59 = arith.constant 0 : index
    %c0_60 = arith.constant 0 : index
    %c0_61 = arith.constant 0 : index
    %141 = vector.load %arg7[%c0_59, %c0_60, %c0_61] : memref<2x4x1xf32, #tpu.memory_space<vmem>>, vector<2x4x1xf32>
    tpu.vector_store %arg7[%c0_59, %c0_60, %c0_61], %140 {strides = array<i32>} : memref<2x4x1xf32, #tpu.memory_space<vmem>>, vector<2x4x1xf32>,
    %c0_62 = arith.constant 0 : index
    %c0_63 = arith.constant 0 : index
    %c0_64 = arith.constant 0 : index
    %142 = vector.load %arg8[%c0_62, %c0_63, %c0_64] : memref<2x4x8xf32, #tpu.memory_space<vmem>>, vector<2x4x8xf32>
    tpu.vector_store %arg8[%c0_62, %c0_63, %c0_64], %118 {strides = array<i32>} : memref<2x4x8xf32, #tpu.memory_space<vmem>>, vector<2x4x8xf32>,
    return
  }
  func.func @transform_0(%arg0: i32) -> (i32, i32, i32) {
    %c0_i32 = arith.constant 0 : i32
    %c0_i32_0 = arith.constant 0 : i32
    %c0_i32_1 = arith.constant 0 : i32
    return %arg0, %c0_i32, %c0_i32_0 : i32, i32, i32
  }
  func.func @transform_1(%arg0: i32) -> (i32, i32, i32) {
    %c0_i32 = arith.constant 0 : i32
    %c0_i32_0 = arith.constant 0 : i32
    %c0_i32_1 = arith.constant 0 : i32
    return %arg0, %c0_i32, %c0_i32_0 : i32, i32, i32
  }
  func.func @transform_2(%arg0: i32) -> (i32, i32, i32) {
    %c0_i32 = arith.constant 0 : i32
    %c0_i32_0 = arith.constant 0 : i32
    %c0_i32_1 = arith.constant 0 : i32
    return %arg0, %c0_i32, %c0_i32_0 : i32, i32, i32
  }
  func.func @transform_3(%arg0: i32) -> (i32, i32) {
    %c0_i32 = arith.constant 0 : i32
    %c0_i32_0 = arith.constant 0 : i32
    %c0_i32_1 = arith.constant 0 : i32
    return %c0_i32, %c0_i32_0 : i32, i32
  }
  func.func @transform_4(%arg0: i32) -> (i32, i32) {
    %c0_i32 = arith.constant 0 : i32
    %c0_i32_0 = arith.constant 0 : i32
    %c0_i32_1 = arith.constant 0 : i32
    return %c0_i32, %c0_i32_0 : i32, i32
  }
  func.func @transform_5(%arg0: i32) -> (i32, i32, i32) {
    %c0_i32 = arith.constant 0 : i32
    %c0_i32_0 = arith.constant 0 : i32
    %c0_i32_1 = arith.constant 0 : i32
    %c0_i32_2 = arith.constant 0 : i32
    return %c0_i32, %c0_i32_0, %c0_i32_1 : i32, i32, i32
  }
  func.func @transform_6(%arg0: i32) -> (i32, i32, i32) {
    %c0_i32 = arith.constant 0 : i32
    %c0_i32_0 = arith.constant 0 : i32
    %c0_i32_1 = arith.constant 0 : i32
    return %arg0, %c0_i32, %c0_i32_0 : i32, i32, i32
  }
  func.func @transform_7(%arg0: i32) -> (i32, i32, i32) {
    %c0_i32 = arith.constant 0 : i32
    %c0_i32_0 = arith.constant 0 : i32
    %c0_i32_1 = arith.constant 0 : i32
    return %arg0, %c0_i32, %c0_i32_0 : i32, i32, i32
  }
}

</mosaic_0001>

<bundles_post_ra>
// kernel: tpu_custom_call.1
= control target key start
LH: loop header
LB: loop body
LE: loop exit
PB: predicated region body
PF: predicated region fallthrough
CT: control target
= control target key end

     0   :  { %v859_v1 = vmov 0   ;;  %s1189_s0 = inlined_call_operand.vmem [shape: f32[2,4,1], index: 0, kind: input, shape index: {}]   ;;  %s1190_s1 = inlined_call_operand.vmem [shape: f32[2,8,32], index: 1, kind: input, shape index: {}]   ;;  %s1191_s2 = inlined_call_operand.vmem [shape: f32[2,8,32], index: 2, kind: input, shape index: {}]   ;;  %s1192_s3 = inlined_call_operand.vmem [shape: f32[74,32], index: 3, kind: input, shape index: {}]   ;;  %s1193_s4 = inlined_call_operand.vmem [shape: f32[66,32], index: 4, kind: input, shape index: {}]   ;;  %s1194_s5 = inlined_call_operand.vmem [shape: f32[2,97,64], index: 5, kind: input, shape index: {}]   ;;  %s1195_s6 = inlined_call_operand.vmem [shape: f32[2,4,1], index: 6, kind: output, shape index: {0}]   ;;  %s1196_s7 = inlined_call_operand.hbm [shape: f32[2,4,8], index: 7, kind: output, shape index: {1}]  }
   0x1   :  { %v26_v0 = vld [vmem:[%s1189_s0] sm:$0xf]  ;;  %798 = vset.pattern.permute.xlu0 %v859_v1 }
   0x2   :  { %59 = vperm.xlu0 %798, %v26_v0  }
   0x3   :  { %13 = vsyncpa [#allocation3], 0  ;;  %v27_v2 = vld [vmem:[%s1189_s0 + $0x4] sm:$0xf]  ;;  %v50_v3 = vld [vmem:[%s1193_s4 + $0x18] sm:$0xff]  ;;  %vm90_vm0 = vcmask 1043456  }
   0x4   :  { %119 = vmatpush.msra.mxu0 %v50_v3  ;;  %v49_v4 = vld [vmem:[%s1193_s4 + $0x10] sm:$0xff]  ;;  %v48_v5 = vld [vmem:[%s1193_s4 + $0x8] sm:$0xff]  ;;  %v47_v6 = vld [vmem:[%s1193_s4] sm:$0xff]  ;;  %v860_v7 = vmov 839922192   ;;  %vm104_vm1 = vcmask 261120  }
   0x5   :  { %v63_v8 = vunpack.c.l.s4 %v860_v7  ;;  %v34_v9 = vld [vmem:[%s1192_s3 + $0x2] sm:$0xf]  ;;  %v799_v11 = vld [vmem:[%s1192_s3] ss:$0 sm:$0xff]  ;;  %v800_v14 = vld [vmem:[%s1192_s3 + $0x1] ss:$0 sm:$0xff] }
   0x6   :  { %120 = vmatpush.msra.mxu0 %v49_v4  ;;  %v88_v12 = vrot.slane %v34_v9, 4  ;;  %v77_v20 = vrot.slane %v799_v11, 4  ;;  %v83_v22 = vrot.slane %v800_v14, 4  ;;  %v801_v29 = vld [vmem:[%s1193_s4 + $0x20] ss:$0 sm:$0xff]  ;;  %vm138_vm2 = vcmask 1041408  }
   0x7   :  { %v64_v10 = vunpack.c.0.s8 %v63_v8  ;;  %s861_s20 = smov 64   ;;  %s862_s21 = smov 32   ;;  %v175_v43 = vld [vmem:[%s1194_s5 + $0x58] sm:$0xff]  ;;  %v174_v44 = vld [vmem:[%s1194_s5 + $0x50] sm:$0xff]  ;;  %v173_v45 = vld [vmem:[%s1194_s5 + $0x48] sm:$0xff]  ;;  %vm161_vm3 = vcmask 523264  }
   0x8   :  { %121 = vmatpush.msra.mxu0 %v48_v5  ;;  %v91_v17 = vsel %vm90_vm0, %v34_v9, %v88_v12  ;;  %191 = vmatpush.msra.mxu1 %v175_v43  ;;  %v172_v46 = vld [vmem:[%s1194_s5 + $0x40] sm:$0xff]  ;;  %v171_v47 = vld [vmem:[%s1194_s5 + $0x38] sm:$0xff]  ;;  %v170_v48 = vld [vmem:[%s1194_s5 + $0x30] sm:$0xff]  ;;  %vm184_vm4 = vcmask 785408   ;;  %s863_s9 = smov 96   ;;  %vm314_vm9 = vcmask 60416  }
   0x9   :  { %v93_v24 = vrot.slane %v91_v17, 4  ;;  %v169_v49 = vld [vmem:[%s1194_s5 + $0x28] sm:$0xff]  ;;  %v168_v50 = vld [vmem:[%s1194_s5 + $0x20] sm:$0xff]  ;;  %v167_v51 = vld [vmem:[%s1194_s5 + $0x18] sm:$0xff]  ;;  %vm337_vm10 = vcmask 64512   ;;  %s864_s15 = smov [#allocation2]  }
   0xa   :  { %68 = vperm.xlu0 %798, %v27_v2   ;;  %122 = vmatpush.msra.mxu0 %v47_v6  ;;  %v166_v52 = vld [vmem:[%s1194_s5 + $0x10] sm:$0xff]  ;;  %v165_v53 = vld [vmem:[%s1194_s5 + $0x8] sm:$0xff]  ;;  %v164_v54 = vld [vmem:[%s1194_s5] sm:$0xff]  ;;  %s740_s16 = sshll.u32 %s864_s15, 4  ;;  %s742_s18 = sshll.u32 %s1196_s7, 4  ;;  %vm729_vm15 = vcmask 3072   ;;  %s741_s16 = int_to_ptr.vmem [resolvable:$true] %s740_s16  ;;  %s743_s18 = int_to_ptr.hbm [resolvable:$true] %s742_s18 }
   0xb   :  { %192 = vmatpush.msra.mxu1 %v174_v44  ;;  %v802_v0 = vld [vmem:[%s1194_s5 + $0x60] ss:$0 sm:$0xff]  ;;  %v1007_v2 = vld [vmem:[%s1192_s3 + $0x16] sm:$0xff]  ;;  %v1013_v5 = vld [vmem:[%s1192_s3 + $0xe] sm:$0xff]  ;;  %s865_s22 = smov 4  }
   0xc   :  { %v1002_v1 = vld [vmem:[%s1192_s3 + $0x1e] sm:$0xff] }
   0xd   :  { %193 = vmatpush.msra.mxu1 %v173_v45  ;;  %247 = vmatpush.msra.mxu2 %v1002_v1 }
   0xf   :  { %194 = vmatpush.msra.mxu1 %v172_v46  ;;  %248 = vmatpush.msra.mxu2 %v1007_v2 }
  0x11   :  { %195 = vmatpush.msra.mxu1 %v171_v47  ;;  %249 = vmatpush.msra.mxu2 %v1013_v5 }
  0x13   :  { %196 = vmatpush.msra.mxu1 %v170_v48  ;;  %v30_v48 = vld [vmem:[%s1191_s2] sm:$0xff] }
  0x14   :  { %356 = vmatpush.msrb.mxu0 %v30_v48 }
  0x15   :  { %197 = vmatpush.msra.mxu1 %v169_v49  ;;  %v31_v49 = vld [vmem:[%s1191_s2 + $0x8] sm:$0xff] }
  0x17   :  { %198 = vmatpush.msra.mxu1 %v168_v50 }
  0x19   :  { %199 = vmatpush.msra.mxu1 %v167_v51 }
  0x1b   :  { %200 = vmatpush.msra.mxu1 %v166_v52 }
  0x1d   :  { %201 = vmatpush.msra.mxu1 %v165_v53 }
  0x1f   :  { %202 = vmatpush.msra.mxu1 %v164_v54 }
  0x74   :  { %v60_v13 = vpop.permute.xlu0 %59 }
  0x75   :  { %v65_v15 = vperm.slane %v60_v13, %v64_v10 }
  0x77   :  { %v79_v16 = vmul.f32 %v799_v11, %v65_v15 }
  0x79   :  { %v85_v18 = vadd.f32 %v800_v14, %v79_v16 }
  0x7b   :  { %v933_v19 = vadd.f32 %v91_v17, %v85_v18 }
  0x7c   :  { %v69_v21 = vpop.permute.xlu0 %68 }
  0x7d   :  { %100 = vst [vmem:[#allocation1] ss:$2 sm:$0xff] %v933_v19  ;;  %v74_v23 = vperm.slane %v69_v21, %v64_v10 }
  0x7f   :  { %v80_v25 = vmul.f32 %v77_v20, %v74_v23  ;;  %v35_v20 = vld [vmem:[%s1192_s3 + $0x6] sm:$0xff] }
  0x80   :  { %250 = vmatpush.msra.mxu2 %v35_v20  ;;  %v1028_v23 = vld [vmem:[%s1190_s1] sm:$0xff] }
  0x81   :  { %v86_v26 = vadd.f32 %v83_v22, %v80_v25  ;;  %760 = vmatpush.xpose.msk.msra.mxu3 %vm104_vm1, %v1028_v23  ;;  %v1040_v25 = vld [vmem:[%s1192_s3 + $0x26] ss:$0 sm:$0xff] }
  0x82   :  { %379 = vmatpush.msrb.mxu2 %v31_v49 }
  0x83   :  { %v936_v27 = vadd.f32 %v93_v24, %v86_v26  ;;  %v29_v24 = vld [vmem:[%s1190_s1 + $0x8] sm:$0xff] }
  0x84   :  { %785 = vmatpush.xpose.msk.msrb.mxu1 %vm104_vm1, %v29_v24 }
  0x85   :  { %102 = vst [vmem:[#allocation1 + $0x1] ss:$2 sm:$0xff] %v936_v27  ;;  %762 = vmatpush.xpose.msk.msrb.mxu3 %vm104_vm1, %v29_v24  ;;  %v771_v24 = vld [vmem:[%s1194_s5 + $0x88] sm:$0xff] }
  0x8c   :  { %v103_v28 = vld.sshfl [vmem:[#allocation1] sm:$0xff pattern:$0x75316420] }
  0x8d   :  { %756 = vmatmul.msk.f32.vlgmr.msra.gmra.mxu0 %vm104_vm1, %v103_v28 }
 0x10a   :  { %v124_v30 = vpop.f32.mrf.mxu0 }
 0x10b   :  { %v943_v31 = vadd.f32 %v801_v29, %v124_v30 }
 0x10d   :  { %v128_v32 = vrot.slane %v943_v31, 4  ;;  %129 = vst [vmem:[#allocation1] ss:$2 sm:$0xff] %v943_v31 }
 0x10f   :  { %132 = vst [vmem:[#allocation1 + $0x10] ss:$2 sm:$0xff] %v128_v32 }
 0x114   :  { %v130_v33 = vld.sshfl [vmem:[#allocation1] sm:$0xff pattern:$0x75316420] }
 0x115   :  { %v134_v34 = vrot.slane %v130_v33, 6 }
 0x116   :  { %v133_v35 = vld.sshfl [vmem:[#allocation1 + $0x10] sm:$0xff pattern:$0x75316420] }
 0x117   :  { %v139_v36 = vsel %vm138_vm2, 1.0, %v134_v34  ;;  %v135_v39 = vrot.slane %v133_v35, 6 }
 0x118   :  { %v151_v37 = vrot.slane %v139_v36, 2  ;;  %v143_v38 = vrot.slane %v139_v36, 1 }
 0x119   :  { %v140_v40 = vsel %vm138_vm2, 1.0, %v135_v39 }
 0x11a   :  { %153 = vrot.lane.b32.xlu2 %v151_v37, %s861_s20  ;;  %145 = vrot.lane.b32.xlu1 %v143_v38, %s862_s21  ;;  %v152_v41 = vrot.slane %v140_v40, 2  ;;  %v144_v42 = vrot.slane %v140_v40, 1 }
 0x122   :  { %155 = vrot.lane.b32.xlu2 %v152_v41, %s861_s20  ;;  %147 = vrot.lane.b32.xlu1 %v144_v42, %s862_s21 }
 0x174   :  { %v154_v55 = vpop.permute.xlu2 %153 }
 0x17c   :  { %v156_v60 = vpop.permute.xlu2 %155 }
 0x18c   :  { %v146_v56 = vpop.permute.xlu1 %145 }
 0x18d   :  { %v159_v57 = vsel %vm104_vm1, %v139_v36, %v146_v56  ;;  %v55_v56 = vld [vmem:[%s1193_s4 + $0x39] sm:$0xff] }
 0x18e   :  { %v162_v58 = vsel %vm161_vm3, %v159_v57, %v154_v55  ;;  %v54_v57 = vld [vmem:[%s1193_s4 + $0x31] sm:$0xff] }
 0x18f   :  { %180 = vst [vmem:[#allocation1] ss:$2 sm:$0xff] %v162_v58  ;;  %v53_v58 = vld [vmem:[%s1193_s4 + $0x29] sm:$0xff] }
 0x194   :  { %v148_v59 = vpop.permute.xlu1 %147 }
 0x195   :  { %v160_v61 = vsel %vm104_vm1, %v140_v40, %v148_v59  ;;  %v52_v59 = vld [vmem:[%s1193_s4 + $0x21] sm:$0xff] }
 0x196   :  { %v163_v62 = vsel %vm161_vm3, %v160_v61, %v156_v60 }
 0x197   :  { %182 = vst [vmem:[#allocation1 + $0x1] ss:$2 sm:$0xff] %v163_v62 }
 0x19e   :  { %v183_v63 = vld.sshfl [vmem:[#allocation1] sm:$0xff pattern:$0x75316420] }
 0x19f   :  { %257 = vst [vmem:[#allocation1 + $0x1] ss:$2 sm:$0xff] %v936_v27  ;;  %757 = vmatmul.msk.f32.vlgmr.msra.gmra.mxu1 %vm184_vm4, %v183_v63  ;;  %v1078_v63 = vld [vmem:[%s1193_s4 + $0x41] ss:$0 sm:$0xff] }
 0x1a0   :  { %255 = vst [vmem:[#allocation1] ss:$2 sm:$0xff] %v933_v19  ;;  %683 = vmatpush.msra.mxu1 %v55_v56 }
 0x1a2   :  { %684 = vmatpush.msra.mxu1 %v54_v57 }
 0x1a4   :  { %685 = vmatpush.msra.mxu1 %v53_v58 }
 0x1a6   :  { %686 = vmatpush.msra.mxu1 %v52_v59 }
 0x1a7   :  { %v258_v29 = vld.sshfl [vmem:[#allocation1] sm:$0xff pattern:$0x75316420] }
 0x21c   :  { %v204_v3 = vpop.f32.mrf.mxu1 }
 0x21d   :  { %v205_v4 = vadd.f32 %v802_v0, %v204_v3 }
 0x21f   :  { %v758_v6 = vmul.f32 -1.442695, %v205_v4 }
 0x221   :  { %809 = vpow2.f32 %v758_v6 }
 0x227   :  { %v810_v7 = vpop.eup %809 }
 0x228   :  { %v210_v8 = vadd.f32 1.0, %v810_v7 }
 0x22a   :  { %811 = vrcp.f32 %v210_v8  ;;  %v222_v12 = vand.u32 2147483648, %v210_v8  ;;  %v220_v14 = vand.u32 2147483647, %v210_v8  ;;  %vm216_vm6 = vweird.f32 %v210_v8 }
 0x22c   :  { %v223_v16 = vor.u32 1.1754944e-38, %v222_v12  ;;  %vm221_vm8 = vcmp.eq.f32.partialorder %v220_v14, 8.507059e+37 }
 0x230   :  { %v812_v9 = vpop.eup %811 }
 0x231   :  { %v212_v10 = vmul.f32 %v812_v9, %v210_v8  ;;  %vm217_vm5 = vweird.f32 %v812_v9 }
 0x232   :  { %vm218_vm7 = vmor %vm216_vm6, %vm217_vm5 }
 0x233   :  { %v213_v11 = vsub.f32 1.0, %v212_v10 }
 0x235   :  { %v214_v13 = vmul.f32 %v812_v9, %v213_v11 }
 0x237   :  { %v215_v15 = vadd.f32 %v812_v9, %v214_v13 }
 0x239   :  { %v219_v17 = vsel %vm218_vm7, %v812_v9, %v215_v15 }
 0x23a   :  { %v224_v18 = vsel %vm221_vm8, %v223_v16, %v219_v17  ;;  %v778_v16 = vld [vmem:[%s1194_s5 + $0xc0] sm:$0xff]  ;;  %v777_v17 = vld [vmem:[%s1194_s5 + $0xb8] sm:$0xff] }
 0x23b   :  { %227 = vrot.lane.b32.xlu0 %v224_v18, %s863_s9  ;;  %479 = vmatpush.msra.mxu0 %v778_v16  ;;  %v776_v18 = vld [vmem:[%s1194_s5 + $0xb0] sm:$0xff] }
 0x23d   :  { %480 = vmatpush.msra.mxu0 %v777_v17 }
 0x23f   :  { %481 = vmatpush.msra.mxu0 %v776_v18 }
 0x2ad   :  { %v228_v21 = vpop.permute.xlu0 %227 }
 0x2ae   :  { %v1021_v22 = vmul.f32 %v228_v21, %v205_v4  ;;  %v774_v21 = vld [vmem:[%s1194_s5 + $0xa0] sm:$0xff] }
 0x2b0   :  { %759 = vmatmul.msk.f32.vlgmr.msra.gmra.mxu2 %vm104_vm1, %v1021_v22 }
 0x2b1   :  { %534 = vmatpush.msra.mxu2 %v1002_v1 }
 0x2b3   :  { %535 = vmatpush.msra.mxu2 %v1007_v2 }
 0x2b5   :  { %536 = vmatpush.msra.mxu2 %v1013_v5 }
 0x2b7   :  { %537 = vmatpush.msra.mxu2 %v35_v20  ;;  %v775_v20 = vld [vmem:[%s1194_s5 + $0xa8] sm:$0xff] }
 0x2b8   :  { %482 = vmatpush.msra.mxu0 %v775_v20 }
 0x2ba   :  { %483 = vmatpush.msra.mxu0 %v774_v21 }
 0x333   :  { %v252_v26 = vpop.f32.mrf.mxu2 }
 0x334   :  { %v253_v28 = vadd.f32 %v1040_v25, %v252_v26  ;;  %v770_v26 = vld [vmem:[%s1194_s5 + $0x80] sm:$0xff] }
 0x336   :  { %v260_v30 = vadd.f32 %v258_v29, %v253_v28  ;;  %v769_v28 = vld [vmem:[%s1194_s5 + $0x78] sm:$0xff]  ;;  %v768_v29 = vld [vmem:[%s1194_s5 + $0x70] sm:$0xff] }
 0x338   :  { %v261_v32 = vmul.f32 0.70710677, %v260_v30  ;;  %v767_v30 = vld [vmem:[%s1194_s5 + $0x68] sm:$0xff] }
 0x33a   :  { %761 = vmatmul.msk.f32.vlgmr.msra.gmra.mxu3 %vm104_vm1, %v261_v32  ;;  %v263_v33 = vrot.slane %v261_v32, 4 }
 0x33b   :  { %405 = vmatpush.msra.mxu3 %v55_v56 }
 0x33d   :  { %406 = vmatpush.msra.mxu3 %v54_v57 }
 0x33f   :  { %407 = vmatpush.msra.mxu3 %v53_v58 }
 0x341   :  { %408 = vmatpush.msra.mxu3 %v52_v59 }
 0x342   :  { %763 = vmatmul.msk.f32.vlgmr.msrb.gmra.mxu3 %vm104_vm1, %v263_v33 }
 0x343   :  { %783 = vmatpush.xpose.msk.msrb.mxu3 %vm104_vm1, %v1028_v23  ;;  %v772_v23 = vld [vmem:[%s1194_s5 + $0x90] sm:$0xff] }
 0x3bd   :  { %v286_v34 = vpop.f32.mrf.mxu3 }
 0x3be   :  { %v315_v35 = vsel %vm314_vm9, %v286_v34, -inf }
 0x3bf   :  { %316 = vmax.xlane.f32.xlu2 %v315_v35 }
 0x3c5   :  { %v311_v36 = vpop.f32.mrf.mxu3 }
 0x3c6   :  { %v318_v37 = vsel %vm314_vm9, %v311_v36, -inf }
 0x3c7   :  { %319 = vmax.xlane.f32.xlu1 %v318_v37 }
 0x432   :  { %v317_v38 = vpop.xlane.xlu2 %316 }
 0x433   :  { %v321_v39 = vsub.f32 %v286_v34, %v317_v38 }
 0x435   :  { %v323_v40 = vmul.f32 1.442695, %v321_v39 }
 0x437   :  { %813 = vpow2.f32 %v323_v40 }
 0x43a   :  { %v320_v41 = vpop.xlane.xlu1 %319 }
 0x43b   :  { %v322_v42 = vsub.f32 %v311_v36, %v320_v41  ;;  %v805_v41 = vld [vmem:[%s1194_s5 + $0xc8] ss:$0 sm:$0xff] }
 0x43d   :  { %v814_v43 = vpop.eup %813  ;;  %v325_v44 = vmul.f32 1.442695, %v322_v42 }
 0x43e   :  { %v327_v45 = vsel %vm314_vm9, %v814_v43, 0.0 }
 0x43f   :  { %815 = vpow2.f32 %v325_v44  ;;  %328 = vadd.xlane.f32.xlu2 %v327_v45 }
 0x445   :  { %v816_v46 = vpop.eup %815 }
 0x446   :  { %v330_v47 = vsel %vm314_vm9, %v816_v46, 0.0 }
 0x447   :  { %331 = vadd.xlane.f32.xlu0 %v330_v47 }
 0x4b2   :  { %v329_v50 = vpop.xlane.xlu2 %328 }
 0x4b3   :  { %817 = vrcp.f32 %v329_v50 }
 0x4b9   :  { %v818_v51 = vpop.eup %817 }
 0x4ba   :  { %v332_v52 = vpop.xlane.xlu0 %331  ;;  %v335_v53 = vmul.f32 %v818_v51, %v814_v43 }
 0x4bb   :  { %819 = vrcp.f32 %v332_v52 }
 0x4bc   :  { %764 = vmatmul.msk.f32.vlgmr.msrb.gmra.mxu0 %vm337_vm10, %v335_v53 }
 0x4c1   :  { %v820_v54 = vpop.eup %819 }
 0x4c2   :  { %v336_v55 = vmul.f32 %v820_v54, %v816_v46 }
 0x4c4   :  { %765 = vmatmul.msk.f32.vlgmr.msrb.gmra.mxu2 %vm337_vm10, %v336_v55 }
 0x4c5   :  { %635 = vmatpush.msrb.mxu2 %v30_v48 }
 0x539   :  { %v358_v60 = vpop.f32.mrf.mxu0 }
 0x53a   :  { %387 = vst [vmem:[#allocation1] ss:$2 sm:$0xff] %v358_v60 }
 0x547   :  { %v381_v61 = vpop.f32.mrf.mxu2 }
 0x548   :  { %389 = vst [vmem:[#allocation1 + $0x1] ss:$2 sm:$0xff] %v381_v61 }
 0x54f   :  { %v390_v62 = vld.sshfl [vmem:[#allocation1] sm:$0xff pattern:$0x75316420] }
 0x550   :  { %766 = vmatmul.msk.f32.vlgmr.msra.gmra.mxu3 %vm104_vm1, %v390_v62 }
 0x551   :  { %658 = vmatpush.msra.mxu3 %v31_v49 }
 0x5d3   :  { %v410_v0 = vpop.f32.mrf.mxu3 }
 0x5d4   :  { %v411_v1 = vadd.f32 %v1078_v63, %v410_v0 }
 0x5d6   :  { %v413_v2 = vadd.f32 %v411_v1, %v1021_v22  ;;  %v773_v22 = vld [vmem:[%s1194_s5 + $0x98] sm:$0xff] }
 0x5d7   :  { %484 = vmatpush.msra.mxu0 %v773_v22 }
 0x5d8   :  { %v414_v3 = vmul.f32 0.70710677, %v413_v2 }
 0x5d9   :  { %485 = vmatpush.msra.mxu0 %v772_v23  ;;  %v43_v23 = vld [vmem:[%s1192_s3 + $0x3f] sm:$0xff] }
 0x5da   :  { %v415_v4 = vadd.f32 %v414_v3, %v943_v31 }
 0x5db   :  { %486 = vmatpush.msra.mxu0 %v771_v24  ;;  %v42_v24 = vld [vmem:[%s1192_s3 + $0x37] sm:$0xff] }
 0x5dc   :  { %v1083_v5 = vmul.f32 0.70710677, %v415_v4 }
 0x5dd   :  { %487 = vmatpush.msra.mxu0 %v770_v26  ;;  %v41_v26 = vld [vmem:[%s1192_s3 + $0x2f] sm:$0xff] }
 0x5de   :  { %v418_v6 = vrot.slane %v1083_v5, 4  ;;  %419 = vst [vmem:[#allocation1] ss:$2 sm:$0xff] %v1083_v5 }
 0x5df   :  { %488 = vmatpush.msra.mxu0 %v769_v28  ;;  %v40_v28 = vld [vmem:[%s1192_s3 + $0x27] sm:$0xff] }
 0x5e0   :  { %422 = vst [vmem:[#allocation1 + $0x10] ss:$2 sm:$0xff] %v418_v6 }
 0x5e1   :  { %489 = vmatpush.msra.mxu0 %v768_v29 }
 0x5e3   :  { %490 = vmatpush.msra.mxu0 %v767_v30 }
 0x5e5   :  { %v420_v7 = vld.sshfl [vmem:[#allocation1] sm:$0xff pattern:$0x75316420] }
 0x5e6   :  { %v424_v8 = vrot.slane %v420_v7, 6 }
 0x5e7   :  { %v423_v9 = vld.sshfl [vmem:[#allocation1 + $0x10] sm:$0xff pattern:$0x75316420] }
 0x5e8   :  { %v428_v10 = vsel %vm138_vm2, 1.0, %v424_v8  ;;  %v425_v11 = vrot.slane %v423_v9, 6 }
 0x5e9   :  { %v440_v12 = vrot.slane %v428_v10, 2  ;;  %v432_v13 = vrot.slane %v428_v10, 1 }
 0x5ea   :  { %v429_v14 = vsel %vm138_vm2, 1.0, %v425_v11 }
 0x5eb   :  { %442 = vrot.lane.b32.xlu0 %v440_v12, %s861_s20  ;;  %434 = vrot.lane.b32.xlu1 %v432_v13, %s862_s21  ;;  %v433_v31 = vrot.slane %v429_v14, 1  ;;  %v441_v15 = vrot.slane %v429_v14, 2 }
 0x5ed   :  { %436 = vrot.lane.b32.xlu2 %v433_v31, %s862_s21 }
 0x5f3   :  { %444 = vrot.lane.b32.xlu1 %v441_v15, %s861_s20 }
 0x647   :  { %v437_v36 = vpop.permute.xlu2 %436 }
 0x648   :  { %v449_v37 = vsel %vm104_vm1, %v429_v14, %v437_v36  ;;  %v806_v36 = vld [vmem:[%s1192_s3 + $0x47] ss:$0 sm:$0xff] }
 0x65d   :  { %v443_v32 = vpop.permute.xlu0 %442  ;;  %v435_v33 = vpop.permute.xlu1 %434 }
 0x65e   :  { %v448_v34 = vsel %vm104_vm1, %v428_v10, %v435_v33 }
 0x65f   :  { %v450_v35 = vsel %vm161_vm3, %v448_v34, %v443_v32 }
 0x660   :  { %469 = vst [vmem:[#allocation1] ss:$2 sm:$0xff] %v450_v35 }
 0x665   :  { %v445_v38 = vpop.permute.xlu1 %444 }
 0x666   :  { %v451_v39 = vsel %vm161_vm3, %v449_v37, %v445_v38 }
 0x667   :  { %471 = vst [vmem:[#allocation1 + $0x1] ss:$2 sm:$0xff] %v451_v39 }
 0x66e   :  { %v472_v40 = vld.sshfl [vmem:[#allocation1] sm:$0xff pattern:$0x75316420] }
 0x66f   :  { %780 = vmatmul.msk.f32.vlgmr.msra.gmra.mxu0 %vm184_vm4, %v472_v40  ;;  %542 = vst [vmem:[#allocation1] ss:$2 sm:$0xff] %v933_v19  ;;  %v808_v40 = vld [vmem:[%s1192_s3 + $0x49] ss:$0 sm:$0xff] }
 0x670   :  { %544 = vst [vmem:[#allocation1 + $0x1] ss:$2 sm:$0xff] %v936_v27 }
 0x677   :  { %v545_v59 = vld.sshfl [vmem:[#allocation1] sm:$0xff pattern:$0x75316420] }
 0x6ec   :  { %v492_v42 = vpop.f32.mrf.mxu0 }
 0x6ed   :  { %v493_v43 = vadd.f32 %v805_v41, %v492_v42 }
 0x6ef   :  { %v781_v44 = vmul.f32 -1.442695, %v493_v43 }
 0x6f1   :  { %821 = vpow2.f32 %v781_v44 }
 0x6f7   :  { %v822_v45 = vpop.eup %821 }
 0x6f8   :  { %v498_v46 = vadd.f32 1.0, %v822_v45 }
 0x6fa   :  { %823 = vrcp.f32 %v498_v46  ;;  %v510_v50 = vand.u32 2147483648, %v498_v46  ;;  %v508_v19 = vand.u32 2147483647, %v498_v46  ;;  %vm504_vm12 = vweird.f32 %v498_v46 }
 0x6fc   :  { %v511_v27 = vor.u32 1.1754944e-38, %v510_v50  ;;  %vm509_vm14 = vcmp.eq.f32.partialorder %v508_v19, 8.507059e+37 }
 0x700   :  { %v824_v47 = vpop.eup %823 }
 0x701   :  { %v500_v48 = vmul.f32 %v824_v47, %v498_v46  ;;  %vm505_vm11 = vweird.f32 %v824_v47 }
 0x702   :  { %vm506_vm13 = vmor %vm504_vm12, %vm505_vm11 }
 0x703   :  { %v501_v49 = vsub.f32 1.0, %v500_v48 }
 0x705   :  { %v502_v51 = vmul.f32 %v824_v47, %v501_v49 }
 0x707   :  { %v503_v52 = vadd.f32 %v824_v47, %v502_v51 }
 0x709   :  { %v507_v53 = vsel %vm506_vm13, %v824_v47, %v503_v52 }
 0x70a   :  { %v512_v54 = vsel %vm509_vm14, %v511_v27, %v507_v53 }
 0x70b   :  { %515 = vrot.lane.b32.xlu0 %v512_v54, %s863_s9 }
 0x77d   :  { %v516_v55 = vpop.permute.xlu0 %515 }
 0x77e   :  { %v518_v56 = vmul.f32 %v516_v55, %v493_v43 }
 0x780   :  { %782 = vmatmul.msk.f32.vlgmr.msra.gmra.mxu2 %vm104_vm1, %v518_v56 }
 0x781   :  { %711 = vmatpush.msra.mxu2 %v43_v23 }
 0x783   :  { %712 = vmatpush.msra.mxu2 %v42_v24 }
 0x785   :  { %713 = vmatpush.msra.mxu2 %v41_v26 }
 0x787   :  { %714 = vmatpush.msra.mxu2 %v40_v28 }
 0x803   :  { %v539_v57 = vpop.f32.mrf.mxu2 }
 0x804   :  { %v540_v58 = vadd.f32 %v1040_v25, %v539_v57 }
 0x806   :  { %v547_v60 = vadd.f32 %v545_v59, %v540_v58 }
 0x808   :  { %v548_v61 = vmul.f32 0.70710677, %v547_v60 }
 0x80a   :  { %v550_v62 = vrot.slane %v548_v61, 4  ;;  %784 = vmatmul.msk.f32.vlgmr.msrb.gmra.mxu3 %vm104_vm1, %v548_v61 }
 0x80c   :  { %786 = vmatmul.msk.f32.vlgmr.msrb.gmra.mxu1 %vm104_vm1, %v550_v62 }
 0x889   :  { %v592_v0 = vpop.f32.mrf.mxu1 }
 0x88a   :  { %v598_v1 = vsel %vm314_vm9, %v592_v0, -inf }
 0x88b   :  { %599 = vmax.xlane.f32.xlu1 %v598_v1 }
 0x88d   :  { %v570_v2 = vpop.f32.mrf.mxu3 }
 0x88e   :  { %v595_v3 = vsel %vm314_vm9, %v570_v2, -inf }
 0x88f   :  { %596 = vmax.xlane.f32.xlu2 %v595_v3 }
 0x8fe   :  { %v600_v4 = vpop.xlane.xlu1 %599 }
 0x8ff   :  { %v602_v6 = vsub.f32 %v592_v0, %v600_v4 }
 0x901   :  { %v605_v7 = vmul.f32 1.442695, %v602_v6 }
 0x902   :  { %v597_v25 = vpop.xlane.xlu2 %596 }
 0x903   :  { %825 = vpow2.f32 %v605_v7  ;;  %v601_v8 = vsub.f32 %v570_v2, %v597_v25 }
 0x905   :  { %v603_v9 = vmul.f32 1.442695, %v601_v8 }
 0x907   :  { %827 = vpow2.f32 %v603_v9 }
 0x909   :  { %v826_v10 = vpop.eup %825 }
 0x90a   :  { %v610_v11 = vsel %vm314_vm9, %v826_v10, 0.0 }
 0x90b   :  { %611 = vadd.xlane.f32.xlu2 %v610_v11 }
 0x90d   :  { %v828_v12 = vpop.eup %827 }
 0x90e   :  { %v607_v13 = vsel %vm314_vm9, %v828_v12, 0.0 }
 0x90f   :  { %608 = vadd.xlane.f32.xlu0 %v607_v13 }
 0x97e   :  { %v612_v14 = vpop.xlane.xlu2 %611 }
 0x97f   :  { %829 = vrcp.f32 %v612_v14 }
 0x982   :  { %v609_v31 = vpop.xlane.xlu0 %608 }
 0x983   :  { %831 = vrcp.f32 %v609_v31 }
 0x985   :  { %v830_v15 = vpop.eup %829 }
 0x986   :  { %v616_v16 = vmul.f32 %v830_v15, %v826_v10 }
 0x988   :  { %733 = vst.msk [vmem:[#allocation2 + $0x4] sm:$0xf] %vm314_vm9, %v616_v16  ;;  %788 = vmatmul.msk.f32.vlgmr.msra.gmra.mxu3 %vm337_vm10, %v616_v16 }
 0x989   :  { %v832_v17 = vpop.eup %831 }
 0x98a   :  { %v615_v18 = vmul.f32 %v832_v17, %v828_v12 }
 0x98c   :  { %732 = vst.msk [vmem:[#allocation2] sm:$0xf] %vm314_vm9, %v615_v18  ;;  %787 = vmatmul.msk.f32.vlgmr.msrb.gmra.mxu2 %vm337_vm10, %v615_v18 }
 0x98d   :  { %748 = dma.vmem_to_hbm [thread:$0]  %s741_s16, 128, %s743_s18, [#allocation3], %s861_s20, %s861_s20, %s865_s22  }
 0xa0b   :  { %v660_v20 = vpop.f32.mrf.mxu3 }
 0xa0c   :  { %667 = vst [vmem:[#allocation1 + $0x1] ss:$2 sm:$0xff] %v660_v20 }
 0xa0f   :  { %v637_v21 = vpop.f32.mrf.mxu2 }
 0xa10   :  { %665 = vst [vmem:[#allocation1] ss:$2 sm:$0xff] %v637_v21 }
 0xa17   :  { %v668_v22 = vld.sshfl [vmem:[#allocation1] sm:$0xff pattern:$0x75316420] }
 0xa18   :  { %789 = vmatmul.msk.f32.vlgmr.msra.gmra.mxu1 %vm104_vm1, %v668_v22 }
 0xa95   :  { %v688_v29 = vpop.f32.mrf.mxu1 }
 0xa96   :  { %v689_v30 = vadd.f32 %v1078_v63, %v688_v29  ;;  %v807_v63 = vld [vmem:[%s1192_s3 + $0x48] ss:$0 sm:$0xff] }
 0xa98   :  { %v691_v32 = vadd.f32 %v689_v30, %v518_v56 }
 0xa9a   :  { %v692_v33 = vmul.f32 0.70710677, %v691_v32 }
 0xa9c   :  { %v693_v34 = vadd.f32 %v692_v33, %v1083_v5 }
 0xa9e   :  { %v694_v35 = vmul.f32 0.70710677, %v693_v34 }
 0xaa0   :  { %790 = vmatmul.msk.f32.vlgmr.msra.gmra.mxu2 %vm104_vm1, %v694_v35 }
 0xb23   :  { %v716_v5 = vpop.f32.mrf.mxu2 }
 0xb24   :  { %v717_v37 = vadd.f32 %v806_v36, %v716_v5 }
 0xb26   :  { %v720_v38 = vmul.f32 %v807_v63, %v717_v37 }
 0xb28   :  { %v721_v39 = vsel %vm104_vm1, %v720_v38, 0.0 }
 0xb29   :  { %722 = vadd.xlane.f32.xlu1 %v721_v39 }
 0xb9c   :  { %v723_v41 = vpop.xlane.xlu1 %722 }
 0xb9d   :  { %v725_v42 = vadd.f32 %v808_v40, %v723_v41 }
 0xb9f   :  { %v727_v43 = vrot.slane %v725_v42, 4  ;;  %730 = vst.msk [vmem:[%s1195_s6] sm:$0xf] %vm729_vm15, %v725_v42 }
 0xba1   :  { %731 = vst.msk [vmem:[%s1195_s6 + $0x4] sm:$0xf] %vm729_vm15, %v727_v43 }
 0xba2   :  { %857 = dma.done.wait [#allocation3], 128  }
 0xba3   :  { %858 = vsyncadd [#allocation3], 4294967168 }
 0xba4   :  { %755 = vsyncpa [#allocation3], 1 }

</bundles_post_ra>
